<compile_context>
chip_gen: v6e
topology: v6e:2x2x1
jax: 0.10.0
libtpu: 0.0.40
codegen_flags: <defaults>
</compile_context>

<pallas_src>
import numpy as np
import jax
import jax.numpy as jnp
from jax.experimental import pallas as pl
from jax.experimental.pallas import tpu as pltpu

EPS = 1e-5  # PyTorch BatchNorm1d default eps

# ----------------------------- problem sizes --------------------------------
B            = 8        # batch (demo size; kernel works for any B >= 2)
NUM_BLOCKS   = 2
REP_DIM      = 8
GROUP_PARAM  = REP_DIM * REP_DIM                 # 64
STATE_PARAM  = NUM_BLOCKS * GROUP_PARAM          # state_space_dim_param = 128
STATE_REP    = NUM_BLOCKS * REP_DIM * REP_DIM    # state_space_dim_rep   = 128
LANES        = STATE_REP                         # flat lane width (128)
NUM_ACTIONS  = 6
ACT_PAD      = 8        # one-hot width padded to 8 (extra cols/rows are zero)
HIDDEN_SIZE  = 32       # constructor arg (default 256, shrunk for the demo)
LIMIT        = 16       # reward head outputs 2*LIMIT + 1 = 33 logits
ENC_HIDDEN   = 256      # hard-coded 256 inside the module
REW_HIDDEN2  = 256      # hard-coded 256 inside the module
IN_DIM       = STATE_REP + NUM_ACTIONS           # only_action_transition = False


# ---------------- roll-direction probe (runs once, at import) ----------------
def _roll_probe_kernel(x_ref, o_ref):
    o_ref[...] = pltpu.roll(x_ref[...], 1, 1)


def _detect_roll_moves_up() -> bool:
    """True if pltpu.roll follows np.roll semantics (positive shift moves
    elements toward higher lane indices)."""
    x = jnp.tile(jnp.arange(LANES, dtype=jnp.float32)[None, :], (8, 1))
    y = pl.pallas_call(
        _roll_probe_kernel,
        out_shape=jax.ShapeDtypeStruct((8, LANES), jnp.float32),
    )(x)
    row = np.asarray(y)[0]
    if row[1] == 0.0:          # lane 0 moved to lane 1 -> np.roll convention
        return True
    assert row[1] == 2.0, "unexpected pltpu.roll semantics"
    return False


_ROLL_MOVES_UP = _detect_roll_moves_up()


def _roll_up(x, amount):
    """Cyclic lane roll moving elements toward HIGHER lane indices by `amount`."""
    amount = amount % LANES
    if amount == 0:
        return x
    shift = amount if _ROLL_MOVES_UP else LANES - amount
    return pltpu.roll(x, shift, 1)


def _group_broadcast(x, slot, step):
    """`x` (B, 128) is nonzero only in the `slot`-th step-wide slot of every
    aligned (8*step)-lane group.  Broadcast that slot to all 8 slots of its
    group (XLU rolls + VPU adds; exact because 8*step divides 128)."""
    y = _roll_up(x, (-slot * step) % LANES)   # move the live slot to slot 0
    y = y + _roll_up(y, step)                 # slots {0, 1}
    y = y + _roll_up(y, 2 * step)             # slots {0..3}
    y = y + _roll_up(y, 4 * step)             # slots {0..7}
    return y


# ------------------------------- fused kernel --------------------------------
def _fused_kernel(action_ref, s_flat_ref,
                  enc_w1s_ref, enc_w1a_ref, enc_b1_ref, enc_g_ref, enc_bt_ref,
                  enc_w2_ref, enc_b2_ref,
                  rew_w1_ref, rew_b1_ref, rew_g_ref, rew_bt_ref,
                  rew_w2_ref, rew_b2_ref, rew_w3_ref, rew_b3_ref,
                  next_state_ref, reward_ref):
    f32 = jnp.float32
    s_flat = s_flat_ref[...]                                     # (B, 128) f32
    bsz = s_flat.shape[0]

    def mxu(a_f32, w_ref):
        # bf16 MXU operands (weights stored bf16), f32 accumulation.
        return jnp.dot(a_f32.astype(jnp.bfloat16), w_ref[...],
                       preferred_element_type=f32)

    def batchnorm(h, g_ref, bt_ref):
        # Training-mode BatchNorm1d, per-call batch stats (biased variance),
        # single reduction pass: var = E[x^2] - E[x]^2.
        mean = jnp.mean(h, axis=0, keepdims=True)
        var = jnp.mean(h * h, axis=0, keepdims=True) - mean * mean
        return (h - mean) * jax.lax.rsqrt(var + EPS) * g_ref[...] + bt_ref[...]

    # ---- one-hot(action) built in-kernel.  Out-of-range actions give an
    #      all-zero row (torch scatter would error) -- callers must pass
    #      actions in [0, NUM_ACTIONS).
    act = action_ref[...]                                        # (B, 1) int32
    onehot = (jax.lax.broadcasted_iota(jnp.int32, (bsz, ACT_PAD), 1)
              == act).astype(f32)                                # (B, 8); cols >= 6 are 0

    # ---- action encoder: Linear -> BatchNorm1d -> ReLU -> Linear ------------
    # concat([onehot, state]) @ W1 == onehot @ W1[:6] + state @ W1[6:]
    h = mxu(s_flat, enc_w1s_ref) + mxu(onehot, enc_w1a_ref) + enc_b1_ref[...]
    h = jnp.maximum(batchnorm(h, enc_g_ref, enc_bt_ref), 0.0)
    ap = mxu(h, enc_w2_ref) + enc_b2_ref[...]                    # (B, 128) f32

    # ---- group rep + compose on the flat lane-dense (B, 128) layout ---------
    # next = (I + p) @ state = state + p @ state, evaluated as
    #     state + sum_j A_j * B_j                            (all f32, VPU/XLU)
    #   A_j[b, n*64+i*8+k] = ap    [b, n*64+i*8+j]   (bcast within 8-lane rows)
    #   B_j[b, n*64+i*8+k] = state [b, n*64+j*8+k]   (bcast row j within block)
    lane = jax.lax.broadcasted_iota(jnp.int32, (bsz, LANES), 1)
    col_in_row = lane % REP_DIM                 # j position inside a block row
    row_in_blk = (lane // REP_DIM) % REP_DIM    # i position inside a block
    acc = s_flat
    for j in range(REP_DIM):
        a_j = _group_broadcast(jnp.where(col_in_row == j, ap, 0.0), j, 1)
        b_j = _group_broadcast(jnp.where(row_in_blk == j, s_flat, 0.0), j, REP_DIM)
        acc = acc + a_j * b_j
    next_state_ref[...] = acc                   # lane-dense (B, 128) output

    # ---- reward head: Linear -> BN -> ReLU -> Linear -> ReLU -> Linear ------
    r = mxu(acc, rew_w1_ref) + rew_b1_ref[...]
    r = jnp.maximum(batchnorm(r, rew_g_ref, rew_bt_ref), 0.0)
    r = jnp.maximum(mxu(r, rew_w2_ref) + rew_b2_ref[...], 0.0)
    # 33-lane masked store accepted (review: low priority; padding to 128 would
    # just push an extra slice into XLA glue outside).
    reward_ref[...] = mxu(r, rew_w3_ref) + rew_b3_ref[...]


# ------------------------------ full forward ---------------------------------
@jax.jit
def forward_pallas(state, action, params):
    bsz = action.shape[0]
    s_flat = state.reshape(bsz, STATE_REP)                # free row-major reshape
    act2d = action.reshape(bsz, 1).astype(jnp.int32)

    ns_flat, reward = pl.pallas_call(
        _fused_kernel,
        out_shape=(jax.ShapeDtypeStruct((bsz, STATE_REP), jnp.float32),
                   jax.ShapeDtypeStruct((bsz, 2 * LIMIT + 1), jnp.float32)),
        # no grid / no BlockSpecs: single invocation, whole arrays in VMEM
    )(act2d, s_flat,
      params["enc_w1_state"], params["enc_w1_act"], params["enc_b1"],
      params["enc_g"], params["enc_bt"], params["enc_w2"], params["enc_b2"],
      params["rew_w1"], params["rew_b1"], params["rew_g"], params["rew_bt"],
      params["rew_w2"], params["rew_b2"], params["rew_w3"], params["rew_b3"])

    return ns_flat.reshape(bsz, NUM_BLOCKS, REP_DIM, REP_DIM), reward


# --------------------------- pure-JAX reference ------------------------------
def forward_reference(state, action, params):
    """f32 reference (HIGHEST matmul precision) using the same bf16-stored
    weights upcast to f32."""
    hi = jax.lax.Precision.HIGHEST
    f32 = jnp.float32
    bsz = action.shape[0]
    onehot = jax.nn.one_hot(action, NUM_ACTIONS, dtype=f32)
    w1 = jnp.concatenate([params["enc_w1_act"][:NUM_ACTIONS].astype(f32),
                          params["enc_w1_state"].astype(f32)], axis=0)
    x = jnp.concatenate([onehot, state.reshape(bsz, -1)], axis=1)

    def bn(h, g, bt):
        m = h.mean(0, keepdims=True)
        v = ((h - m) ** 2).mean(0, keepdims=True)
        return (h - m) / jnp.sqrt(v + EPS) * g + bt

    h = jnp.maximum(bn(jnp.dot(x, w1, precision=hi) + params["enc_b1"],
                       params["enc_g"], params["enc_bt"]), 0.0)
    ap = jnp.dot(h, params["enc_w2"].astype(f32), precision=hi) + params["enc_b2"]
    reps = (jnp.eye(REP_DIM, dtype=f32)
            + ap.reshape(bsz, NUM_BLOCKS, REP_DIM, REP_DIM))
    next_state = jnp.einsum("bnij,bnjk->bnik", reps, state, precision=hi)

    h = jnp.maximum(bn(jnp.dot(next_state.reshape(bsz, -1),
                               params["rew_w1"].astype(f32), precision=hi)
                       + params["rew_b1"], params["rew_g"], params["rew_bt"]), 0.0)
    h = jnp.maximum(jnp.dot(h, params["rew_w2"].astype(f32), precision=hi)
                    + params["rew_b2"], 0.0)
    next_reward = (jnp.dot(h, params["rew_w3"].astype(f32), precision=hi)
                   + params["rew_b3"])
    return next_state, next_reward


# ------------------------------ param init -----------------------------------
def init_params(key):
    def lin(key, fan_in, fan_out):
        kw, kb = jax.random.split(key)
        bound = 1.0 / np.sqrt(fan_in)
        w = jax.random.uniform(kw, (fan_in, fan_out), jnp.float32, -bound, bound)
        b = jax.random.uniform(kb, (1, fan_out), jnp.float32, -bound, bound)
        return w, b

    keys = jax.random.split(key, 5)
    enc_w1, enc_b1 = lin(keys[0], IN_DIM, ENC_HIDDEN)
    enc_w2, enc_b2 = lin(keys[1], ENC_HIDDEN, STATE_PARAM)
    rew_w1, rew_b1 = lin(keys[2], STATE_REP, HIDDEN_SIZE)
    rew_w2, rew_b2 = lin(keys[3], HIDDEN_SIZE, REW_HIDDEN2)
    rew_w3, rew_b3 = lin(keys[4], REW_HIDDEN2, 2 * LIMIT + 1)

    # Split W1 at init time: rows [0:6] multiply the one-hot, rows [6:] multiply
    # the flattened state (matches torch.cat([onehot, state], dim=1) ordering).
    # The action slice is zero-padded to 8 rows to match the padded one-hot.
    enc_w1_act = jnp.zeros((ACT_PAD, ENC_HIDDEN), jnp.float32)
    enc_w1_act = enc_w1_act.at[:NUM_ACTIONS].set(enc_w1[:NUM_ACTIONS])
    enc_w1_state = enc_w1[NUM_ACTIONS:]

    bf16 = jnp.bfloat16
    return dict(
        # weight matrices committed to bf16 (MXU-native; halves weight DMA)
        enc_w1_act=enc_w1_act.astype(bf16),
        enc_w1_state=enc_w1_state.astype(bf16),
        enc_w2=enc_w2.astype(bf16),
        rew_w1=rew_w1.astype(bf16),
        rew_w2=rew_w2.astype(bf16),
        rew_w3=rew_w3.astype(bf16),
        # biases / BatchNorm affine params stay f32 (added on the VPU in f32)
        enc_b1=enc_b1, enc_b2=enc_b2,
        enc_g=jnp.ones((1, ENC_HIDDEN), jnp.float32),
        enc_bt=jnp.zeros((1, ENC_HIDDEN), jnp.float32),
        rew_b1=rew_b1, rew_b2=rew_b2, rew_b3=rew_b3,
        rew_g=jnp.ones((1, HIDDEN_SIZE), jnp.float32),
        rew_bt=jnp.zeros((1, HIDDEN_SIZE), jnp.float32),
    )


# --------------------------------- main ---------------------------------------
if __name__ == "__main__":
    key = jax.random.PRNGKey(0)
    k_state, k_action, k_param = jax.random.split(key, 3)

    state = jax.random.normal(k_state, (B, NUM_BLOCKS, REP_DIM, REP_DIM), jnp.float32)
    action = jax.random.randint(k_action, (B,), 0, NUM_ACTIONS, jnp.int32)
    params = init_params(k_param)

    next_state, next_reward = forward_pallas(state, action, params)
    jax.block_until_ready((next_state, next_reward))

    ref_state, ref_reward = forward_reference(state, action, params)
    assert next_state.shape == (B, NUM_BLOCKS, REP_DIM, REP_DIM)
    assert next_reward.shape == (B, 2 * LIMIT + 1)
    # Tolerance: the kernel feeds the MXU bf16 operands (explicit precision
    # policy, see header); the reference runs the same bf16-stored weights in
    # f32 / HIGHEST precision.  2e-2 budgets bf16 activation rounding through
    # the five matmul layers; the compose itself is exact f32 in both paths.
    np.testing.assert_allclose(np.asarray(next_state), np.asarray(ref_state),
                               rtol=2e-2, atol=2e-2)
    np.testing.assert_allclose(np.asarray(next_reward), np.asarray(ref_reward),
                               rtol=2e-2, atol=2e-2)

    print("KERNEL_OK")
</pallas_src>

<mosaic_0001>
module attributes {stable_mosaic.version = 11 : i64} {
  func.func @_roll_probe_kernel(%arg0: memref<8x128xf32, #tpu.memory_space<vmem>>, %arg1: memref<8x128xf32, #tpu.memory_space<vmem>>) attributes {dimension_semantics = [], scalar_prefetch = 0 : i64, scratch_operands = 0 : i64, tpu.core_type = #tpu.core_type<tc>} {
    %c0 = arith.constant 0 : index
    %c0_0 = arith.constant 0 : index
    %0 = vector.load %arg0[%c0, %c0_0] : memref<8x128xf32, #tpu.memory_space<vmem>>, vector<8x128xf32>
    %c1_i32 = arith.constant 1 : i32
    %1 = tpu.dynamic_rotate %0 by %c1_i32 dim 1 : vector<8x128xf32>, i32 -> vector<8x128xf32>
    %c0_1 = arith.constant 0 : index
    %c0_2 = arith.constant 0 : index
    %2 = vector.load %arg1[%c0_1, %c0_2] : memref<8x128xf32, #tpu.memory_space<vmem>>, vector<8x128xf32>
    tpu.vector_store %arg1[%c0_1, %c0_2], %1 {strides = array<i32>} : memref<8x128xf32, #tpu.memory_space<vmem>>, vector<8x128xf32>,
    return
  }
}

</mosaic_0001>

<bundles_post_ra>
// kernel: tpu_custom_call.1
= control target key start
LH: loop header
LB: loop body
LE: loop exit
PB: predicated region body
PF: predicated region fallthrough
CT: control target
= control target key end

     0   :  { %6 = vsyncpa [#allocation3], 0  ;;  %s106_s0 = inlined_call_operand.hbm [shape: f32[8,128], index: 0, kind: input, shape index: {}]   ;;  %s107_s1 = inlined_call_operand.hbm [shape: f32[8,128], index: 1, kind: output, shape index: {}]  }
   0x1   :  { %7 = vsyncpa [#allocation4], 0  ;;  %s87_s6 = smov [#allocation2]  }
   0x2   :  { %s14_s7 = sshll.u32 %s87_s6, 4  ;;  %s15_s7 = int_to_ptr.vmem [resolvable:$true] %s14_s7 }
   0x3   :  { %s51_s8 = scalar_lea.vmem %s15_s7, 128  ;;  %p56_p1 = scmp.lt.s32.totalorder %s15_s7, %s15_s7 }
   0x4   :  { %p52_p0 = scmp.ne.s32.totalorder %s15_s7, %s51_s8  ;;  %p57_p2 = scmp.lt.s32.totalorder %s51_s8, %s51_s8 }
   0x6   :  { %p58_p3 = por %p57_p2, %p56_p1 }
   0x8   :  { %p59_p4 = pnand %p58_p3, %p52_p0 }
   0xa   :  { %62 = shalt.err (!%p59_p4)
}
   0xb   :  { %17 = dma.hbm_to_vmem [thread:$0]  %s106_s0, 128, %s15_s7, [#allocation3]  }
   0xc   :  { %83 = dma.done.wait [#allocation3], 128  }
   0xd   :  { %84 = vsyncadd [#allocation3], 4294967168  ;;  %v21_v0 = vld [vmem:[#allocation2] sm:$0xff]  ;;  %s88_s11 = smov 1   ;;  %s89_s12 = smov [#allocation5]  }
   0xe   :  { %22 = vrot.lane.b32.xlu0 %v21_v0, %s88_s11  ;;  %s31_s13 = sshll.u32 %s89_s12, 4  ;;  %s32_s13 = int_to_ptr.vmem [resolvable:$true] %s31_s13 }
   0xf   :  { %s63_s14 = scalar_lea.vmem %s32_s13, 128  ;;  %p68_p6 = scmp.lt.s32.totalorder %s32_s13, %s32_s13 }
  0x10   :  { %p64_p5 = scmp.ne.s32.totalorder %s32_s13, %s63_s14  ;;  %p69_p7 = scmp.lt.s32.totalorder %s63_s14, %s63_s14 }
  0x12   :  { %p70_p8 = por %p69_p7, %p68_p6 }
  0x14   :  { %p71_p9 = pnand %p70_p8, %p64_p5 }
  0x80   :  { %v23_v1 = vpop.permute.xlu0 %22 }
  0x81   :  { %24 = vst [vmem:[#allocation5] sm:$0xff] %v23_v1 }
  0x82   :  { %74 = shalt.err (!%p71_p9)
}
  0x83   :  { %34 = dma.vmem_to_hbm [thread:$0]  %s32_s13, 128, %s107_s1, [#allocation4]  }
  0x84   :  { %85 = dma.done.wait [#allocation4], 128  }
  0x85   :  { %86 = vsyncadd [#allocation4], 4294967168 }
  0x86   :  { %38 = vsyncpa [#allocation3], 1 }
  0x87   :  { %39 = vsyncpa [#allocation4], 1 }

</bundles_post_ra>
